<compile_context>
chip_gen: v5e
topology: v5e:2x2
jax: 0.10.0
libtpu: 0.0.40
codegen_flags: <defaults>
</compile_context>

<pallas_src>
import functools
import math

import jax
import jax.numpy as jnp
from jax.experimental import pallas as pl
from jax.experimental.pallas import tpu as pltpu

NEG_INF = -1e9


# --------------------------------------------------------------------------
# In-kernel helpers (traced inside the fused layer kernels)
# --------------------------------------------------------------------------
def _mm(x_f32, w_ref, b_ref):
    """x (M,K) f32  @  w_ref (K,N) bf16  +  b_ref (1,N) f32  ->  (M,N) f32.

    bf16 MXU operands, f32 accumulation."""
    y = jnp.dot(x_f32.astype(jnp.bfloat16), w_ref[...],
                preferred_element_type=jnp.float32)
    return y + b_ref[...]


def _layernorm(y, g_ref, b_ref, eps=1e-5):
    mu = jnp.mean(y, axis=-1, keepdims=True)
    var = jnp.mean(jnp.square(y - mu), axis=-1, keepdims=True)
    return (y - mu) * jax.lax.rsqrt(var + eps) * g_ref[...] + b_ref[...]


def _mha(q, k, v, addmask, wo_ref, bo_ref, num_heads):
    """Multi-head attention for one batch element, heads handled in-kernel.

    q (Sq,D), k/v (Sk,D) f32; addmask additive, broadcastable to (Sq,Sk).
    The output projection wo (D,D) is folded into the per-head loop, so the result is
    produced lane-dense as (Sq, D) with no head transpose / concat and no HBM traffic.
    """
    Sq, D = q.shape
    Dh = D // num_heads
    scale = 1.0 / math.sqrt(Dh)
    out = jnp.zeros((Sq, D), jnp.float32) + bo_ref[...]
    for h in range(num_heads):                       # static unroll (small H)
        sl = slice(h * Dh, (h + 1) * Dh)
        qh = q[:, sl].astype(jnp.bfloat16)
        kh = k[:, sl].astype(jnp.bfloat16)
        vh = v[:, sl].astype(jnp.bfloat16)
        # contract the head dim directly (no explicit k.T transpose)
        s = jax.lax.dot_general(qh, kh, (((1,), (1,)), ((), ())),
                                preferred_element_type=jnp.float32)
        s = s * scale + addmask                      # mask add + softmax in f32
        s = s - jnp.max(s, axis=-1, keepdims=True)
        p = jnp.exp(s)
        p = p * pl.reciprocal(jnp.sum(p, axis=-1, keepdims=True), approx=True)
        oh = jnp.dot(p.astype(jnp.bfloat16), vh, preferred_element_type=jnp.float32)
        # rows [h*Dh:(h+1)*Dh] of wo correspond to head h -> fused output projection
        out = out + jnp.dot(oh.astype(jnp.bfloat16), wo_ref[sl, :],
                            preferred_element_type=jnp.float32)
    return out


# --------------------------------------------------------------------------
# Fused layer kernels (one pallas_call for the whole encoder / decoder layer)
# --------------------------------------------------------------------------
def _encoder_kernel(*refs, ini_run, num_heads):
    if ini_run:
        (obs_ref, fra_ref, femb_ref, mask_ref, we_ref, be_ref,
         wqkv_ref, bqkv_ref, wo_ref, bo_ref, ln1g_ref, ln1b_ref,
         w1_ref, b1_ref, w2_ref, b2_ref, ln2g_ref, ln2b_ref,
         o_ref) = refs
        x = _mm(obs_ref[0].astype(jnp.float32), we_ref, be_ref)       # obs_embed
    else:
        (obs_ref, fra_ref, femb_ref, mask_ref,
         wqkv_ref, bqkv_ref, wo_ref, bo_ref, ln1g_ref, ln1b_ref,
         w1_ref, b1_ref, w2_ref, b2_ref, ln2g_ref, ln2b_ref,
         o_ref) = refs
        x = obs_ref[0].astype(jnp.float32)

    S, D = x.shape

    # fra_emb: x + fra[..., None] * fra_emb
    x = x + fra_ref[0] * femb_ref[0]

    # additive padding mask built in-kernel from the (1, S) keep-mask
    addmask = jnp.where(mask_ref[0] > 0, 0.0, NEG_INF).astype(jnp.float32)

    # fused QKV projection -> self-attention -> (folded) output projection
    qkv = _mm(x, wqkv_ref, bqkv_ref)                                  # (S, 3D)
    sa = _mha(qkv[:, :D], qkv[:, D:2 * D], qkv[:, 2 * D:],
              addmask, wo_ref, bo_ref, num_heads)
    x1 = _layernorm(x + sa, ln1g_ref, ln1b_ref)

    # fused FFN + residual + LayerNorm (hidden never leaves the kernel)
    h = jnp.maximum(_mm(x1, w1_ref, b1_ref), 0.0)
    x2 = _layernorm(x1 + _mm(h, w2_ref, b2_ref), ln2g_ref, ln2b_ref)

    o_ref[0] = x2.astype(o_ref.dtype)


def _decoder_kernel(imp_ref, fra_ref, femb_ref, mem_ref, smask_ref, tmask_ref,
                    we_ref, be_ref,
                    wqkv_ref, bqkv_ref, wo1_ref, bo1_ref, ln1g_ref, ln1b_ref,
                    wq_ref, bq_ref, wkv_ref, bkv_ref, wo2_ref, bo2_ref,
                    ln2g_ref, ln2b_ref,
                    w1_ref, b1_ref, w2_ref, b2_ref, ln3g_ref, ln3b_ref,
                    o_ref, *, num_heads):
    # imp_embed + fra_emb
    y = _mm(imp_ref[0].astype(jnp.float32), we_ref, be_ref)
    y = y + fra_ref[0] * femb_ref[0]
    Sq, D = y.shape

    # masked self-attention (target / causal keep-mask, (Sq, Sq))
    tmask = jnp.where(tmask_ref[0] > 0, 0.0, NEG_INF).astype(jnp.float32)
    qkv = _mm(y, wqkv_ref, bqkv_ref)                                  # (Sq, 3D)
    sa = _mha(qkv[:, :D], qkv[:, D:2 * D], qkv[:, 2 * D:],
              tmask, wo1_ref, bo1_ref, num_heads)
    y1 = _layernorm(y + sa, ln1g_ref, ln1b_ref)

    # cross-attention against encoder memory (source padding keep-mask, (1, Sk))
    mem = mem_ref[0].astype(jnp.float32)
    smask = jnp.where(smask_ref[0] > 0, 0.0, NEG_INF).astype(jnp.float32)
    qc = _mm(y1, wq_ref, bq_ref)
    kv = _mm(mem, wkv_ref, bkv_ref)                                   # (Sk, 2D)
    ca = _mha(qc, kv[:, :D], kv[:, D:], smask, wo2_ref, bo2_ref, num_heads)
    y2 = _layernorm(y1 + ca, ln2g_ref, ln2b_ref)

    # fused FFN + residual + LayerNorm
    h = jnp.maximum(_mm(y2, w1_ref, b1_ref), 0.0)
    y3 = _layernorm(y2 + _mm(h, w2_ref, b2_ref), ln3g_ref, ln3b_ref)

    o_ref[0] = y3.astype(o_ref.dtype)


# --------------------------------------------------------------------------
# Wrappers
# --------------------------------------------------------------------------
def _full_spec(arr):
    n = arr.ndim
    return pl.BlockSpec(arr.shape, lambda *_: (0,) * n)


def encode(params, obs, ini_run, obs_fra, obs_fra_emb, obs_mask, num_heads):
    enc = params["encoder"]
    B, S = obs.shape[0], obs.shape[1]
    Fin = obs.shape[2]
    D = enc["wo"].shape[0]

    tensors = [obs, obs_fra.reshape(B, S, 1), obs_fra_emb, obs_mask]
    tensor_specs = [
        pl.BlockSpec((1, S, Fin), lambda b: (b, 0, 0)),
        pl.BlockSpec((1, S, 1), lambda b: (b, 0, 0)),
        pl.BlockSpec((1, S, D), lambda b: (b, 0, 0)),
        pl.BlockSpec((1, 1, S), lambda b: (b, 0, 0)),
    ]
    weights = []
    if ini_run:
        weights += [params["obs_embed"]["w"], params["obs_embed"]["b"]]
    weights += [enc["wqkv"], enc["bqkv"], enc["wo"], enc["bo"],
                enc["ln1_g"], enc["ln1_b"],
                enc["w1"], enc["b1"], enc["w2"], enc["b2"],
                enc["ln2_g"], enc["ln2_b"]]

    return pl.pallas_call(
        functools.partial(_encoder_kernel, ini_run=ini_run, num_heads=num_heads),
        out_shape=jax.ShapeDtypeStruct((B, S, D), jnp.float32),
        grid=(B,),
        in_specs=tensor_specs + [_full_spec(w) for w in weights],
        out_specs=pl.BlockSpec((1, S, D), lambda b: (b, 0, 0)),
        compiler_params=pltpu.CompilerParams(dimension_semantics=("parallel",)),
    )(*tensors, *weights)


def decode(params, obs_emb, imp, imp_fra, imp_fra_emb, obs_mask, imp_mask, num_heads):
    dec = params["decoder"]
    B, Sq = imp.shape[0], imp.shape[1]
    Fin = imp.shape[2]
    Sk = obs_emb.shape[1]
    D = dec["wo1"].shape[0]

    tensors = [imp, imp_fra.reshape(B, Sq, 1), imp_fra_emb, obs_emb, obs_mask, imp_mask]
    tensor_specs = [
        pl.BlockSpec((1, Sq, Fin), lambda b: (b, 0, 0)),
        pl.BlockSpec((1, Sq, 1), lambda b: (b, 0, 0)),
        pl.BlockSpec((1, Sq, D), lambda b: (b, 0, 0)),
        pl.BlockSpec((1, Sk, D), lambda b: (b, 0, 0)),
        pl.BlockSpec((1, 1, Sk), lambda b: (b, 0, 0)),
        pl.BlockSpec((1, Sq, Sq), lambda b: (b, 0, 0)),
    ]
    weights = [params["imp_embed"]["w"], params["imp_embed"]["b"],
               dec["wqkv"], dec["bqkv"], dec["wo1"], dec["bo1"],
               dec["ln1_g"], dec["ln1_b"],
               dec["wq"], dec["bq"], dec["wkv"], dec["bkv"],
               dec["wo2"], dec["bo2"], dec["ln2_g"], dec["ln2_b"],
               dec["w1"], dec["b1"], dec["w2"], dec["b2"],
               dec["ln3_g"], dec["ln3_b"]]

    return pl.pallas_call(
        functools.partial(_decoder_kernel, num_heads=num_heads),
        out_shape=jax.ShapeDtypeStruct((B, Sq, D), jnp.float32),
        grid=(B,),
        in_specs=tensor_specs + [_full_spec(w) for w in weights],
        out_specs=pl.BlockSpec((1, Sq, D), lambda b: (b, 0, 0)),
        compiler_params=pltpu.CompilerParams(dimension_semantics=("parallel",)),
    )(*tensors, *weights)


def encoder_decoder_forward(params, obs, ini_run, imp, obs_fra, imp_fra,
                            obs_fra_emb, imp_fra_emb, obs_mask, imp_mask, num_heads=4):
    obs_emb = encode(params, obs, ini_run, obs_fra, obs_fra_emb, obs_mask, num_heads)
    imp_emb = decode(params, obs_emb, imp, imp_fra, imp_fra_emb, obs_mask, imp_mask, num_heads)
    return obs_emb, imp_emb
# TODO(synk): gru_transfer is defined in the PyTorch __init__ but never used in forward(); omitted.


# --------------------------------------------------------------------------
# Deterministic parameter init (weights stored bf16 for MXU / HBM traffic,
# biases + LayerNorm params f32)
# --------------------------------------------------------------------------
def init_params(key, F_obs, F_imp, D, Dff):
    ks = iter(jax.random.split(key, 32))

    def w(din, dout):
        return (0.02 * jax.random.normal(next(ks), (din, dout), jnp.float32)
                ).astype(jnp.bfloat16)

    def b(dout):
        return jnp.zeros((1, dout), jnp.float32)

    def ln():
        return jnp.ones((1, D), jnp.float32), jnp.zeros((1, D), jnp.float32)

    e_ln1g, e_ln1b = ln(); e_ln2g, e_ln2b = ln()
    d_ln1g, d_ln1b = ln(); d_ln2g, d_ln2b = ln(); d_ln3g, d_ln3b = ln()

    return dict(
        obs_embed=dict(w=w(F_obs, D), b=b(D)),
        imp_embed=dict(w=w(F_imp, D), b=b(D)),
        encoder=dict(
            wqkv=w(D, 3 * D), bqkv=b(3 * D), wo=w(D, D), bo=b(D),
            ln1_g=e_ln1g, ln1_b=e_ln1b,
            w1=w(D, Dff), b1=b(Dff), w2=w(Dff, D), b2=b(D),
            ln2_g=e_ln2g, ln2_b=e_ln2b),
        decoder=dict(
            wqkv=w(D, 3 * D), bqkv=b(3 * D), wo1=w(D, D), bo1=b(D),
            ln1_g=d_ln1g, ln1_b=d_ln1b,
            wq=w(D, D), bq=b(D), wkv=w(D, 2 * D), bkv=b(2 * D),
            wo2=w(D, D), bo2=b(D), ln2_g=d_ln2g, ln2_b=d_ln2b,
            w1=w(D, Dff), b1=b(Dff), w2=w(Dff, D), b2=b(D),
            ln3_g=d_ln3g, ln3_b=d_ln3b),
    )


# --------------------------------------------------------------------------
if __name__ == "__main__":
    B, S, F_OBS, F_IMP, D, H, DFF = 2, 8, 16, 16, 32, 4, 64

    key = jax.random.PRNGKey(0)
    kp, k1, k2, k3, k4, k5, k6 = jax.random.split(key, 7)

    params = init_params(kp, F_OBS, F_IMP, D, DFF)

    obs = jax.random.normal(k1, (B, S, F_OBS), jnp.float32)
    imp = jax.random.normal(k2, (B, S, F_IMP), jnp.float32)
    obs_fra = jax.random.normal(k3, (B, S), jnp.float32)
    imp_fra = jax.random.normal(k4, (B, S), jnp.float32)
    obs_fra_emb = jax.random.normal(k5, (B, S, D), jnp.float32)
    imp_fra_emb = jax.random.normal(k6, (B, S, D), jnp.float32)

    # source padding mask (B, 1, S): mask out last position of batch 1
    obs_mask = jnp.ones((B, 1, S), jnp.float32).at[1, 0, S - 1].set(0.0)
    # target causal mask (B, S, S)
    imp_mask = jnp.broadcast_to(jnp.tril(jnp.ones((S, S), jnp.float32)), (B, S, S))

    obs_emb, imp_emb = encoder_decoder_forward(
        params, obs, True, imp, obs_fra, imp_fra,
        obs_fra_emb, imp_fra_emb, obs_mask, imp_mask, num_heads=H)

    jax.block_until_ready((obs_emb, imp_emb))
    assert obs_emb.shape == (B, S, D) and imp_emb.shape == (B, S, D)
    assert bool(jnp.all(jnp.isfinite(obs_emb))) and bool(jnp.all(jnp.isfinite(imp_emb)))
    print("KERNEL_OK")
</pallas_src>

<mosaic_0001>
module attributes {stable_mosaic.version = 11 : i64} {
  func.func @_encoder_kernel(%arg0: i32, %arg1: memref<1x8x16xf32, #tpu.memory_space<vmem>>, %arg2: memref<1x8x1xf32, #tpu.memory_space<vmem>>, %arg3: memref<1x8x32xf32, #tpu.memory_space<vmem>>, %arg4: memref<1x1x8xf32, #tpu.memory_space<vmem>>, %arg5: memref<16x32xbf16, #tpu.memory_space<vmem>>, %arg6: memref<1x32xf32, #tpu.memory_space<vmem>>, %arg7: memref<32x96xbf16, #tpu.memory_space<vmem>>, %arg8: memref<1x96xf32, #tpu.memory_space<vmem>>, %arg9: memref<32x32xbf16, #tpu.memory_space<vmem>>, %arg10: memref<1x32xf32, #tpu.memory_space<vmem>>, %arg11: memref<1x32xf32, #tpu.memory_space<vmem>>, %arg12: memref<1x32xf32, #tpu.memory_space<vmem>>, %arg13: memref<32x64xbf16, #tpu.memory_space<vmem>>, %arg14: memref<1x64xf32, #tpu.memory_space<vmem>>, %arg15: memref<64x32xbf16, #tpu.memory_space<vmem>>, %arg16: memref<1x32xf32, #tpu.memory_space<vmem>>, %arg17: memref<1x32xf32, #tpu.memory_space<vmem>>, %arg18: memref<1x32xf32, #tpu.memory_space<vmem>>, %arg19: memref<1x8x32xf32, #tpu.memory_space<vmem>>) attributes {dimension_semantics = [#tpu.dimension_semantics<parallel>], iteration_bounds = array<i64: 2>, scalar_prefetch = 0 : i64, scratch_operands = 0 : i64, tpu.core_type = #tpu.core_type<tc>, window_params = [{transform_indices = @transform_0, window_bounds = array<i64: 1, 8, 16>}, {transform_indices = @transform_1, window_bounds = array<i64: 1, 8, 1>}, {transform_indices = @transform_2, window_bounds = array<i64: 1, 8, 32>}, {transform_indices = @transform_3, window_bounds = array<i64: 1, 1, 8>}, {pipeline_mode = #tpu.pipeline_mode<synchronous>, transform_indices = @transform_4, window_bounds = array<i64: 16, 32>}, {pipeline_mode = #tpu.pipeline_mode<synchronous>, transform_indices = @transform_5, window_bounds = array<i64: 1, 32>}, {pipeline_mode = #tpu.pipeline_mode<synchronous>, transform_indices = @transform_6, window_bounds = array<i64: 32, 96>}, {pipeline_mode = #tpu.pipeline_mode<synchronous>, transform_indices = @transform_7, window_bounds = array<i64: 1, 96>}, {pipeline_mode = #tpu.pipeline_mode<synchronous>, transform_indices = @transform_8, window_bounds = array<i64: 32, 32>}, {pipeline_mode = #tpu.pipeline_mode<synchronous>, transform_indices = @transform_9, window_bounds = array<i64: 1, 32>}, {pipeline_mode = #tpu.pipeline_mode<synchronous>, transform_indices = @transform_10, window_bounds = array<i64: 1, 32>}, {pipeline_mode = #tpu.pipeline_mode<synchronous>, transform_indices = @transform_11, window_bounds = array<i64: 1, 32>}, {pipeline_mode = #tpu.pipeline_mode<synchronous>, transform_indices = @transform_12, window_bounds = array<i64: 32, 64>}, {pipeline_mode = #tpu.pipeline_mode<synchronous>, transform_indices = @transform_13, window_bounds = array<i64: 1, 64>}, {pipeline_mode = #tpu.pipeline_mode<synchronous>, transform_indices = @transform_14, window_bounds = array<i64: 64, 32>}, {pipeline_mode = #tpu.pipeline_mode<synchronous>, transform_indices = @transform_15, window_bounds = array<i64: 1, 32>}, {pipeline_mode = #tpu.pipeline_mode<synchronous>, transform_indices = @transform_16, window_bounds = array<i64: 1, 32>}, {pipeline_mode = #tpu.pipeline_mode<synchronous>, transform_indices = @transform_17, window_bounds = array<i64: 1, 32>}, {transform_indices = @transform_18, window_bounds = array<i64: 1, 8, 32>}]} {
    %c0 = arith.constant 0 : index
    %c0_0 = arith.constant 0 : index
    %c0_1 = arith.constant 0 : index
    %0 = vector.load %arg1[%c0, %c0_0, %c0_1] : memref<1x8x16xf32, #tpu.memory_space<vmem>>, vector<1x8x16xf32>
    %1 = vector.shape_cast %0 : vector<1x8x16xf32> to vector<8x16xf32>
    %2 = arith.truncf %1 : vector<8x16xf32> to vector<8x16xbf16>
    %c0_2 = arith.constant 0 : index
    %c0_3 = arith.constant 0 : index
    %3 = vector.load %arg5[%c0_2, %c0_3] : memref<16x32xbf16, #tpu.memory_space<vmem>>, vector<16x32xbf16>
    %cst = arith.constant dense<0.000000e+00> : vector<8x32xf32>
    %4 = tpu.matmul %2, %3, %cst {dimension_numbers = #tpu.dot_dimension_numbers<[1], [0], [0], [1], [0, 0, 1, 1], [], []>} : vector<8x16xbf16>, vector<16x32xbf16>, vector<8x32xf32> -> vector<8x32xf32>
    %c0_4 = arith.constant 0 : index
    %c0_5 = arith.constant 0 : index
    %5 = vector.load %arg6[%c0_4, %c0_5] : memref<1x32xf32, #tpu.memory_space<vmem>>, vector<1x32xf32>
    %6 = vector.broadcast %5 : vector<1x32xf32> to vector<8x32xf32>
    %7 = arith.addf %4, %6 : vector<8x32xf32>
    %c0_6 = arith.constant 0 : index
    %c0_7 = arith.constant 0 : index
    %c0_8 = arith.constant 0 : index
    %8 = vector.load %arg2[%c0_6, %c0_7, %c0_8] : memref<1x8x1xf32, #tpu.memory_space<vmem>>, vector<1x8x1xf32>
    %9 = vector.shape_cast %8 : vector<1x8x1xf32> to vector<8x1xf32>
    %c0_9 = arith.constant 0 : index
    %c0_10 = arith.constant 0 : index
    %c0_11 = arith.constant 0 : index
    %10 = vector.load %arg3[%c0_9, %c0_10, %c0_11] : memref<1x8x32xf32, #tpu.memory_space<vmem>>, vector<1x8x32xf32>
    %11 = vector.shape_cast %10 : vector<1x8x32xf32> to vector<8x32xf32>
    %12 = vector.broadcast %9 : vector<8x1xf32> to vector<8x32xf32>
    %13 = arith.mulf %12, %11 : vector<8x32xf32>
    %14 = arith.addf %7, %13 : vector<8x32xf32>
    %c0_12 = arith.constant 0 : index
    %c0_13 = arith.constant 0 : index
    %c0_14 = arith.constant 0 : index
    %15 = vector.load %arg4[%c0_12, %c0_13, %c0_14] : memref<1x1x8xf32, #tpu.memory_space<vmem>>, vector<1x1x8xf32>
    %16 = vector.shape_cast %15 : vector<1x1x8xf32> to vector<1x8xf32>
    %cst_15 = arith.constant 0.000000e+00 : f32
    %17 = vector.broadcast %cst_15 : f32 to vector<1x8xf32>
    %18 = arith.cmpf ogt, %16, %17 : vector<1x8xf32>
    %cst_16 = arith.constant 0.000000e+00 : f32
    %cst_17 = arith.constant -1.000000e+09 : f32
    %19 = vector.broadcast %cst_16 : f32 to vector<1x8xf32>
    %20 = vector.broadcast %cst_17 : f32 to vector<1x8xf32>
    %21 = arith.select %18, %19, %20 : vector<1x8xi1>, vector<1x8xf32>
    %22 = arith.truncf %14 : vector<8x32xf32> to vector<8x32xbf16>
    %c0_18 = arith.constant 0 : index
    %c0_19 = arith.constant 0 : index
    %23 = vector.load %arg7[%c0_18, %c0_19] : memref<32x96xbf16, #tpu.memory_space<vmem>>, vector<32x96xbf16>
    %cst_20 = arith.constant dense<0.000000e+00> : vector<8x96xf32>
    %24 = tpu.matmul %22, %23, %cst_20 {dimension_numbers = #tpu.dot_dimension_numbers<[1], [0], [0], [1], [0, 0, 1, 1], [], []>} : vector<8x32xbf16>, vector<32x96xbf16>, vector<8x96xf32> -> vector<8x96xf32>
    %c0_21 = arith.constant 0 : index
    %c0_22 = arith.constant 0 : index
    %25 = vector.load %arg8[%c0_21, %c0_22] : memref<1x96xf32, #tpu.memory_space<vmem>>, vector<1x96xf32>
    %26 = vector.broadcast %25 : vector<1x96xf32> to vector<8x96xf32>
    %27 = arith.addf %24, %26 : vector<8x96xf32>
    %28 = vector.extract_strided_slice %27 {offsets = [0, 0], sizes = [8, 32], strides = [1, 1]} : vector<8x96xf32> to vector<8x32xf32>
    %29 = vector.extract_strided_slice %27 {offsets = [0, 32], sizes = [8, 32], strides = [1, 1]} : vector<8x96xf32> to vector<8x32xf32>
    %30 = vector.extract_strided_slice %27 {offsets = [0, 64], sizes = [8, 32], strides = [1, 1]} : vector<8x96xf32> to vector<8x32xf32>
    %cst_23 = arith.constant 0.000000e+00 : f32
    %31 = vector.broadcast %cst_23 : f32 to vector<8x32xf32>
    %c0_24 = arith.constant 0 : index
    %c0_25 = arith.constant 0 : index
    %32 = vector.load %arg10[%c0_24, %c0_25] : memref<1x32xf32, #tpu.memory_space<vmem>>, vector<1x32xf32>
    %33 = vector.broadcast %32 : vector<1x32xf32> to vector<8x32xf32>
    %34 = arith.addf %31, %33 : vector<8x32xf32>
    %35 = vector.extract_strided_slice %28 {offsets = [0, 0], sizes = [8, 8], strides = [1, 1]} : vector<8x32xf32> to vector<8x8xf32>
    %36 = arith.truncf %35 : vector<8x8xf32> to vector<8x8xbf16>
    %37 = vector.extract_strided_slice %29 {offsets = [0, 0], sizes = [8, 8], strides = [1, 1]} : vector<8x32xf32> to vector<8x8xf32>
    %38 = arith.truncf %37 : vector<8x8xf32> to vector<8x8xbf16>
    %39 = vector.extract_strided_slice %30 {offsets = [0, 0], sizes = [8, 8], strides = [1, 1]} : vector<8x32xf32> to vector<8x8xf32>
    %40 = arith.truncf %39 : vector<8x8xf32> to vector<8x8xbf16>
    %cst_26 = arith.constant dense<0.000000e+00> : vector<8x8xf32>
    %41 = tpu.matmul %36, %38, %cst_26 {dimension_numbers = #tpu.dot_dimension_numbers<[1], [1], [0], [0], [0, 0, 1, 0], [], []>} : vector<8x8xbf16>, vector<8x8xbf16>, vector<8x8xf32> -> vector<8x8xf32>
    %cst_27 = arith.constant 0.353553385 : f32
    %42 = vector.broadcast %cst_27 : f32 to vector<8x8xf32>
    %43 = arith.mulf %41, %42 : vector<8x8xf32>
    %44 = vector.broadcast %21 : vector<1x8xf32> to vector<8x8xf32>
    %45 = arith.addf %43, %44 : vector<8x8xf32>
    %cst_28 = arith.constant dense<0xFF800000> : vector<8xf32>
    %46 = vector.multi_reduction <maximumf>, %45, %cst_28 [1] : vector<8x8xf32> to vector<8xf32>
    %47 = vector.shape_cast %46 : vector<8xf32> to vector<8x1xf32>
    %48 = vector.broadcast %47 : vector<8x1xf32> to vector<8x8xf32>
    %49 = arith.subf %45, %48 : vector<8x8xf32>
    %50 = math.exp %49 : vector<8x8xf32>
    %cst_29 = arith.constant dense<0.000000e+00> : vector<8xf32>
    %51 = vector.multi_reduction <add>, %50, %cst_29 [1] : vector<8x8xf32> to vector<8xf32>
    %52 = vector.shape_cast %51 : vector<8xf32> to vector<8x1xf32>
    %53 = tpu.reciprocal %52 {approx = true} : vector<8x1xf32> -> vector<8x1xf32>
    %54 = vector.broadcast %53 : vector<8x1xf32> to vector<8x8xf32>
    %55 = arith.mulf %50, %54 : vector<8x8xf32>
    %56 = arith.truncf %55 : vector<8x8xf32> to vector<8x8xbf16>
    %cst_30 = arith.constant dense<0.000000e+00> : vector<8x8xf32>
    %57 = tpu.matmul %56, %40, %cst_30 {dimension_numbers = #tpu.dot_dimension_numbers<[1], [0], [0], [1], [0, 0, 1, 1], [], []>} : vector<8x8xbf16>, vector<8x8xbf16>, vector<8x8xf32> -> vector<8x8xf32>
    %58 = arith.truncf %57 : vector<8x8xf32> to vector<8x8xbf16>
    %c0_31 = arith.constant 0 : index
    %c0_32 = arith.constant 0 : index
    %59 = vector.load %arg9[%c0_31, %c0_32] : memref<32x32xbf16, #tpu.memory_space<vmem>>, vector<8x32xbf16>
    %cst_33 = arith.constant dense<0.000000e+00> : vector<8x32xf32>
    %60 = tpu.matmul %58, %59, %cst_33 {dimension_numbers = #tpu.dot_dimension_numbers<[1], [0], [0], [1], [0, 0, 1, 1], [], []>} : vector<8x8xbf16>, vector<8x32xbf16>, vector<8x32xf32> -> vector<8x32xf32>
    %61 = arith.addf %34, %60 : vector<8x32xf32>
    %62 = vector.extract_strided_slice %28 {offsets = [0, 8], sizes = [8, 8], strides = [1, 1]} : vector<8x32xf32> to vector<8x8xf32>
    %63 = arith.truncf %62 : vector<8x8xf32> to vector<8x8xbf16>
    %64 = vector.extract_strided_slice %29 {offsets = [0, 8], sizes = [8, 8], strides = [1, 1]} : vector<8x32xf32> to vector<8x8xf32>
    %65 = arith.truncf %64 : vector<8x8xf32> to vector<8x8xbf16>
    %66 = vector.extract_strided_slice %30 {offsets = [0, 8], sizes = [8, 8], strides = [1, 1]} : vector<8x32xf32> to vector<8x8xf32>
    %67 = arith.truncf %66 : vector<8x8xf32> to vector<8x8xbf16>
    %cst_34 = arith.constant dense<0.000000e+00> : vector<8x8xf32>
    %68 = tpu.matmul %63, %65, %cst_34 {dimension_numbers = #tpu.dot_dimension_numbers<[1], [1], [0], [0], [0, 0, 1, 0], [], []>} : vector<8x8xbf16>, vector<8x8xbf16>, vector<8x8xf32> -> vector<8x8xf32>
    %cst_35 = arith.constant 0.353553385 : f32
    %69 = vector.broadcast %cst_35 : f32 to vector<8x8xf32>
    %70 = arith.mulf %68, %69 : vector<8x8xf32>
    %71 = vector.broadcast %21 : vector<1x8xf32> to vector<8x8xf32>
    %72 = arith.addf %70, %71 : vector<8x8xf32>
    %cst_36 = arith.constant dense<0xFF800000> : vector<8xf32>
    %73 = vector.multi_reduction <maximumf>, %72, %cst_36 [1] : vector<8x8xf32> to vector<8xf32>
    %74 = vector.shape_cast %73 : vector<8xf32> to vector<8x1xf32>
    %75 = vector.broadcast %74 : vector<8x1xf32> to vector<8x8xf32>
    %76 = arith.subf %72, %75 : vector<8x8xf32>
    %77 = math.exp %76 : vector<8x8xf32>
    %cst_37 = arith.constant dense<0.000000e+00> : vector<8xf32>
    %78 = vector.multi_reduction <add>, %77, %cst_37 [1] : vector<8x8xf32> to vector<8xf32>
    %79 = vector.shape_cast %78 : vector<8xf32> to vector<8x1xf32>
    %80 = tpu.reciprocal %79 {approx = true} : vector<8x1xf32> -> vector<8x1xf32>
    %81 = vector.broadcast %80 : vector<8x1xf32> to vector<8x8xf32>
    %82 = arith.mulf %77, %81 : vector<8x8xf32>
    %83 = arith.truncf %82 : vector<8x8xf32> to vector<8x8xbf16>
    %cst_38 = arith.constant dense<0.000000e+00> : vector<8x8xf32>
    %84 = tpu.matmul %83, %67, %cst_38 {dimension_numbers = #tpu.dot_dimension_numbers<[1], [0], [0], [1], [0, 0, 1, 1], [], []>} : vector<8x8xbf16>, vector<8x8xbf16>, vector<8x8xf32> -> vector<8x8xf32>
    %85 = arith.truncf %84 : vector<8x8xf32> to vector<8x8xbf16>
    %c8 = arith.constant 8 : index
    %c0_39 = arith.constant 0 : index
    %86 = vector.load %arg9[%c8, %c0_39] : memref<32x32xbf16, #tpu.memory_space<vmem>>, vector<8x32xbf16>
    %cst_40 = arith.constant dense<0.000000e+00> : vector<8x32xf32>
    %87 = tpu.matmul %85, %86, %cst_40 {dimension_numbers = #tpu.dot_dimension_numbers<[1], [0], [0], [1], [0, 0, 1, 1], [], []>} : vector<8x8xbf16>, vector<8x32xbf16>, vector<8x32xf32> -> vector<8x32xf32>
    %88 = arith.addf %61, %87 : vector<8x32xf32>
    %89 = vector.extract_strided_slice %28 {offsets = [0, 16], sizes = [8, 8], strides = [1, 1]} : vector<8x32xf32> to vector<8x8xf32>
    %90 = arith.truncf %89 : vector<8x8xf32> to vector<8x8xbf16>
    %91 = vector.extract_strided_slice %29 {offsets = [0, 16], sizes = [8, 8], strides = [1, 1]} : vector<8x32xf32> to vector<8x8xf32>
    %92 = arith.truncf %91 : vector<8x8xf32> to vector<8x8xbf16>
    %93 = vector.extract_strided_slice %30 {offsets = [0, 16], sizes = [8, 8], strides = [1, 1]} : vector<8x32xf32> to vector<8x8xf32>
    %94 = arith.truncf %93 : vector<8x8xf32> to vector<8x8xbf16>
    %cst_41 = arith.constant dense<0.000000e+00> : vector<8x8xf32>
    %95 = tpu.matmul %90, %92, %cst_41 {dimension_numbers = #tpu.dot_dimension_numbers<[1], [1], [0], [0], [0, 0, 1, 0], [], []>} : vector<8x8xbf16>, vector<8x8xbf16>, vector<8x8xf32> -> vector<8x8xf32>
    %cst_42 = arith.constant 0.353553385 : f32
    %96 = vector.broadcast %cst_42 : f32 to vector<8x8xf32>
    %97 = arith.mulf %95, %96 : vector<8x8xf32>
    %98 = vector.broadcast %21 : vector<1x8xf32> to vector<8x8xf32>
    %99 = arith.addf %97, %98 : vector<8x8xf32>
    %cst_43 = arith.constant dense<0xFF800000> : vector<8xf32>
    %100 = vector.multi_reduction <maximumf>, %99, %cst_43 [1] : vector<8x8xf32> to vector<8xf32>
    %101 = vector.shape_cast %100 : vector<8xf32> to vector<8x1xf32>
    %102 = vector.broadcast %101 : vector<8x1xf32> to vector<8x8xf32>
    %103 = arith.subf %99, %102 : vector<8x8xf32>
    %104 = math.exp %103 : vector<8x8xf32>
    %cst_44 = arith.constant dense<0.000000e+00> : vector<8xf32>
    %105 = vector.multi_reduction <add>, %104, %cst_44 [1] : vector<8x8xf32> to vector<8xf32>
    %106 = vector.shape_cast %105 : vector<8xf32> to vector<8x1xf32>
    %107 = tpu.reciprocal %106 {approx = true} : vector<8x1xf32> -> vector<8x1xf32>
    %108 = vector.broadcast %107 : vector<8x1xf32> to vector<8x8xf32>
    %109 = arith.mulf %104, %108 : vector<8x8xf32>
    %110 = arith.truncf %109 : vector<8x8xf32> to vector<8x8xbf16>
    %cst_45 = arith.constant dense<0.000000e+00> : vector<8x8xf32>
    %111 = tpu.matmul %110, %94, %cst_45 {dimension_numbers = #tpu.dot_dimension_numbers<[1], [0], [0], [1], [0, 0, 1, 1], [], []>} : vector<8x8xbf16>, vector<8x8xbf16>, vector<8x8xf32> -> vector<8x8xf32>
    %112 = arith.truncf %111 : vector<8x8xf32> to vector<8x8xbf16>
    %c16 = arith.constant 16 : index
    %c0_46 = arith.constant 0 : index
    %113 = vector.load %arg9[%c16, %c0_46] : memref<32x32xbf16, #tpu.memory_space<vmem>>, vector<8x32xbf16>
    %cst_47 = arith.constant dense<0.000000e+00> : vector<8x32xf32>
    %114 = tpu.matmul %112, %113, %cst_47 {dimension_numbers = #tpu.dot_dimension_numbers<[1], [0], [0], [1], [0, 0, 1, 1], [], []>} : vector<8x8xbf16>, vector<8x32xbf16>, vector<8x32xf32> -> vector<8x32xf32>
    %115 = arith.addf %88, %114 : vector<8x32xf32>
    %116 = vector.extract_strided_slice %28 {offsets = [0, 24], sizes = [8, 8], strides = [1, 1]} : vector<8x32xf32> to vector<8x8xf32>
    %117 = arith.truncf %116 : vector<8x8xf32> to vector<8x8xbf16>
    %118 = vector.extract_strided_slice %29 {offsets = [0, 24], sizes = [8, 8], strides = [1, 1]} : vector<8x32xf32> to vector<8x8xf32>
    %119 = arith.truncf %118 : vector<8x8xf32> to vector<8x8xbf16>
    %120 = vector.extract_strided_slice %30 {offsets = [0, 24], sizes = [8, 8], strides = [1, 1]} : vector<8x32xf32> to vector<8x8xf32>
    %121 = arith.truncf %120 : vector<8x8xf32> to vector<8x8xbf16>
    %cst_48 = arith.constant dense<0.000000e+00> : vector<8x8xf32>
    %122 = tpu.matmul %117, %119, %cst_48 {dimension_numbers = #tpu.dot_dimension_numbers<[1], [1], [0], [0], [0, 0, 1, 0], [], []>} : vector<8x8xbf16>, vector<8x8xbf16>, vector<8x8xf32> -> vector<8x8xf32>
    %cst_49 = arith.constant 0.353553385 : f32
    %123 = vector.broadcast %cst_49 : f32 to vector<8x8xf32>
    %124 = arith.mulf %122, %123 : vector<8x8xf32>
    %125 = vector.broadcast %21 : vector<1x8xf32> to vector<8x8xf32>
    %126 = arith.addf %124, %125 : vector<8x8xf32>
    %cst_50 = arith.constant dense<0xFF800000> : vector<8xf32>
    %127 = vector.multi_reduction <maximumf>, %126, %cst_50 [1] : vector<8x8xf32> to vector<8xf32>
    %128 = vector.shape_cast %127 : vector<8xf32> to vector<8x1xf32>
    %129 = vector.broadcast %128 : vector<8x1xf32> to vector<8x8xf32>
    %130 = arith.subf %126, %129 : vector<8x8xf32>
    %131 = math.exp %130 : vector<8x8xf32>
    %cst_51 = arith.constant dense<0.000000e+00> : vector<8xf32>
    %132 = vector.multi_reduction <add>, %131, %cst_51 [1] : vector<8x8xf32> to vector<8xf32>
    %133 = vector.shape_cast %132 : vector<8xf32> to vector<8x1xf32>
    %134 = tpu.reciprocal %133 {approx = true} : vector<8x1xf32> -> vector<8x1xf32>
    %135 = vector.broadcast %134 : vector<8x1xf32> to vector<8x8xf32>
    %136 = arith.mulf %131, %135 : vector<8x8xf32>
    %137 = arith.truncf %136 : vector<8x8xf32> to vector<8x8xbf16>
    %cst_52 = arith.constant dense<0.000000e+00> : vector<8x8xf32>
    %138 = tpu.matmul %137, %121, %cst_52 {dimension_numbers = #tpu.dot_dimension_numbers<[1], [0], [0], [1], [0, 0, 1, 1], [], []>} : vector<8x8xbf16>, vector<8x8xbf16>, vector<8x8xf32> -> vector<8x8xf32>
    %139 = arith.truncf %138 : vector<8x8xf32> to vector<8x8xbf16>
    %c24 = arith.constant 24 : index
    %c0_53 = arith.constant 0 : index
    %140 = vector.load %arg9[%c24, %c0_53] : memref<32x32xbf16, #tpu.memory_space<vmem>>, vector<8x32xbf16>
    %cst_54 = arith.constant dense<0.000000e+00> : vector<8x32xf32>
    %141 = tpu.matmul %139, %140, %cst_54 {dimension_numbers = #tpu.dot_dimension_numbers<[1], [0], [0], [1], [0, 0, 1, 1], [], []>} : vector<8x8xbf16>, vector<8x32xbf16>, vector<8x32xf32> -> vector<8x32xf32>
    %142 = arith.addf %115, %141 : vector<8x32xf32>
    %143 = arith.addf %14, %142 : vector<8x32xf32>
    %cst_55 = arith.constant dense<0.000000e+00> : vector<8xf32>
    %144 = vector.multi_reduction <add>, %143, %cst_55 [1] : vector<8x32xf32> to vector<8xf32>
    %145 = vector.shape_cast %144 : vector<8xf32> to vector<8x1xf32>
    %cst_56 = arith.constant 3.200000e+01 : f32
    %146 = vector.broadcast %cst_56 : f32 to vector<8x1xf32>
    %147 = arith.divf %145, %146 : vector<8x1xf32>
    %148 = vector.broadcast %147 : vector<8x1xf32> to vector<8x32xf32>
    %149 = arith.subf %143, %148 : vector<8x32xf32>
    %150 = arith.mulf %149, %149 : vector<8x32xf32>
    %cst_57 = arith.constant dense<0.000000e+00> : vector<8xf32>
    %151 = vector.multi_reduction <add>, %150, %cst_57 [1] : vector<8x32xf32> to vector<8xf32>
    %152 = vector.shape_cast %151 : vector<8xf32> to vector<8x1xf32>
    %cst_58 = arith.constant 3.200000e+01 : f32
    %153 = vector.broadcast %cst_58 : f32 to vector<8x1xf32>
    %154 = arith.divf %152, %153 : vector<8x1xf32>
    %155 = vector.broadcast %147 : vector<8x1xf32> to vector<8x32xf32>
    %156 = arith.subf %143, %155 : vector<8x32xf32>
    %cst_59 = arith.constant 9.99999974E-6 : f32
    %157 = vector.broadcast %cst_59 : f32 to vector<8x1xf32>
    %158 = arith.addf %154, %157 : vector<8x1xf32>
    %159 = math.rsqrt %158 : vector<8x1xf32>
    %160 = vector.broadcast %159 : vector<8x1xf32> to vector<8x32xf32>
    %161 = arith.mulf %156, %160 : vector<8x32xf32>
    %c0_60 = arith.constant 0 : index
    %c0_61 = arith.constant 0 : index
    %162 = vector.load %arg11[%c0_60, %c0_61] : memref<1x32xf32, #tpu.memory_space<vmem>>, vector<1x32xf32>
    %163 = vector.broadcast %162 : vector<1x32xf32> to vector<8x32xf32>
    %164 = arith.mulf %161, %163 : vector<8x32xf32>
    %c0_62 = arith.constant 0 : index
    %c0_63 = arith.constant 0 : index
    %165 = vector.load %arg12[%c0_62, %c0_63] : memref<1x32xf32, #tpu.memory_space<vmem>>, vector<1x32xf32>
    %166 = vector.broadcast %165 : vector<1x32xf32> to vector<8x32xf32>
    %167 = arith.addf %164, %166 : vector<8x32xf32>
    %168 = arith.truncf %167 : vector<8x32xf32> to vector<8x32xbf16>
    %c0_64 = arith.constant 0 : index
    %c0_65 = arith.constant 0 : index
    %169 = vector.load %arg13[%c0_64, %c0_65] : memref<32x64xbf16, #tpu.memory_space<vmem>>, vector<32x64xbf16>
    %cst_66 = arith.constant dense<0.000000e+00> : vector<8x64xf32>
    %170 = tpu.matmul %168, %169, %cst_66 {dimension_numbers = #tpu.dot_dimension_numbers<[1], [0], [0], [1], [0, 0, 1, 1], [], []>} : vector<8x32xbf16>, vector<32x64xbf16>, vector<8x64xf32> -> vector<8x64xf32>
    %c0_67 = arith.constant 0 : index
    %c0_68 = arith.constant 0 : index
    %171 = vector.load %arg14[%c0_67, %c0_68] : memref<1x64xf32, #tpu.memory_space<vmem>>, vector<1x64xf32>
    %172 = vector.broadcast %171 : vector<1x64xf32> to vector<8x64xf32>
    %173 = arith.addf %170, %172 : vector<8x64xf32>
    %cst_69 = arith.constant 0.000000e+00 : f32
    %174 = vector.broadcast %cst_69 : f32 to vector<8x64xf32>
    %175 = arith.maximumf %173, %174 : vector<8x64xf32>
    %176 = arith.truncf %175 : vector<8x64xf32> to vector<8x64xbf16>
    %c0_70 = arith.constant 0 : index
    %c0_71 = arith.constant 0 : index
    %177 = vector.load %arg15[%c0_70, %c0_71] : memref<64x32xbf16, #tpu.memory_space<vmem>>, vector<64x32xbf16>
    %cst_72 = arith.constant dense<0.000000e+00> : vector<8x32xf32>
    %178 = tpu.matmul %176, %177, %cst_72 {dimension_numbers = #tpu.dot_dimension_numbers<[1], [0], [0], [1], [0, 0, 1, 1], [], []>} : vector<8x64xbf16>, vector<64x32xbf16>, vector<8x32xf32> -> vector<8x32xf32>
    %c0_73 = arith.constant 0 : index
    %c0_74 = arith.constant 0 : index
    %179 = vector.load %arg16[%c0_73, %c0_74] : memref<1x32xf32, #tpu.memory_space<vmem>>, vector<1x32xf32>
    %180 = vector.broadcast %179 : vector<1x32xf32> to vector<8x32xf32>
    %181 = arith.addf %178, %180 : vector<8x32xf32>
    %182 = arith.addf %167, %181 : vector<8x32xf32>
    %cst_75 = arith.constant dense<0.000000e+00> : vector<8xf32>
    %183 = vector.multi_reduction <add>, %182, %cst_75 [1] : vector<8x32xf32> to vector<8xf32>
    %184 = vector.shape_cast %183 : vector<8xf32> to vector<8x1xf32>
    %cst_76 = arith.constant 3.200000e+01 : f32
    %185 = vector.broadcast %cst_76 : f32 to vector<8x1xf32>
    %186 = arith.divf %184, %185 : vector<8x1xf32>
    %187 = vector.broadcast %186 : vector<8x1xf32> to vector<8x32xf32>
    %188 = arith.subf %182, %187 : vector<8x32xf32>
    %189 = arith.mulf %188, %188 : vector<8x32xf32>
    %cst_77 = arith.constant dense<0.000000e+00> : vector<8xf32>
    %190 = vector.multi_reduction <add>, %189, %cst_77 [1] : vector<8x32xf32> to vector<8xf32>
    %191 = vector.shape_cast %190 : vector<8xf32> to vector<8x1xf32>
    %cst_78 = arith.constant 3.200000e+01 : f32
    %192 = vector.broadcast %cst_78 : f32 to vector<8x1xf32>
    %193 = arith.divf %191, %192 : vector<8x1xf32>
    %194 = vector.broadcast %186 : vector<8x1xf32> to vector<8x32xf32>
    %195 = arith.subf %182, %194 : vector<8x32xf32>
    %cst_79 = arith.constant 9.99999974E-6 : f32
    %196 = vector.broadcast %cst_79 : f32 to vector<8x1xf32>
    %197 = arith.addf %193, %196 : vector<8x1xf32>
    %198 = math.rsqrt %197 : vector<8x1xf32>
    %199 = vector.broadcast %198 : vector<8x1xf32> to vector<8x32xf32>
    %200 = arith.mulf %195, %199 : vector<8x32xf32>
    %c0_80 = arith.constant 0 : index
    %c0_81 = arith.constant 0 : index
    %201 = vector.load %arg17[%c0_80, %c0_81] : memref<1x32xf32, #tpu.memory_space<vmem>>, vector<1x32xf32>
    %202 = vector.broadcast %201 : vector<1x32xf32> to vector<8x32xf32>
    %203 = arith.mulf %200, %202 : vector<8x32xf32>
    %c0_82 = arith.constant 0 : index
    %c0_83 = arith.constant 0 : index
    %204 = vector.load %arg18[%c0_82, %c0_83] : memref<1x32xf32, #tpu.memory_space<vmem>>, vector<1x32xf32>
    %205 = vector.broadcast %204 : vector<1x32xf32> to vector<8x32xf32>
    %206 = arith.addf %203, %205 : vector<8x32xf32>
    %c0_84 = arith.constant 0 : index
    %c0_85 = arith.constant 0 : index
    %c0_86 = arith.constant 0 : index
    %207 = vector.load %arg19[%c0_84, %c0_85, %c0_86] : memref<1x8x32xf32, #tpu.memory_space<vmem>>, vector<1x8x32xf32>
    %208 = vector.shape_cast %207 : vector<1x8x32xf32> to vector<8x32xf32>
    %209 = vector.shape_cast %206 : vector<8x32xf32> to vector<1x8x32xf32>
    tpu.vector_store %arg19[%c0_84, %c0_85, %c0_86], %209 {strides = array<i32>} : memref<1x8x32xf32, #tpu.memory_space<vmem>>, vector<1x8x32xf32>,
    return
  }
  func.func @transform_0(%arg0: i32) -> (i32, i32, i32) {
    %c0_i32 = arith.constant 0 : i32
    %c0_i32_0 = arith.constant 0 : i32
    %c0_i32_1 = arith.constant 0 : i32
    return %arg0, %c0_i32, %c0_i32_0 : i32, i32, i32
  }
  func.func @transform_1(%arg0: i32) -> (i32, i32, i32) {
    %c0_i32 = arith.constant 0 : i32
    %c0_i32_0 = arith.constant 0 : i32
    %c0_i32_1 = arith.constant 0 : i32
    return %arg0, %c0_i32, %c0_i32_0 : i32, i32, i32
  }
  func.func @transform_2(%arg0: i32) -> (i32, i32, i32) {
    %c0_i32 = arith.constant 0 : i32
    %c0_i32_0 = arith.constant 0 : i32
    %c0_i32_1 = arith.constant 0 : i32
    return %arg0, %c0_i32, %c0_i32_0 : i32, i32, i32
  }
  func.func @transform_3(%arg0: i32) -> (i32, i32, i32) {
    %c0_i32 = arith.constant 0 : i32
    %c0_i32_0 = arith.constant 0 : i32
    %c0_i32_1 = arith.constant 0 : i32
    return %arg0, %c0_i32, %c0_i32_0 : i32, i32, i32
  }
  func.func @transform_4(%arg0: i32) -> (i32, i32) {
    %c0_i32 = arith.constant 0 : i32
    %c0_i32_0 = arith.constant 0 : i32
    %c0_i32_1 = arith.constant 0 : i32
    return %c0_i32, %c0_i32_0 : i32, i32
  }
  func.func @transform_5(%arg0: i32) -> (i32, i32) {
    %c0_i32 = arith.constant 0 : i32
    %c0_i32_0 = arith.constant 0 : i32
    %c0_i32_1 = arith.constant 0 : i32
    return %c0_i32, %c0_i32_0 : i32, i32
  }
  func.func @transform_6(%arg0: i32) -> (i32, i32) {
    %c0_i32 = arith.constant 0 : i32
    %c0_i32_0 = arith.constant 0 : i32
    %c0_i32_1 = arith.constant 0 : i32
    return %c0_i32, %c0_i32_0 : i32, i32
  }
  func.func @transform_7(%arg0: i32) -> (i32, i32) {
    %c0_i32 = arith.constant 0 : i32
    %c0_i32_0 = arith.constant 0 : i32
    %c0_i32_1 = arith.constant 0 : i32
    return %c0_i32, %c0_i32_0 : i32, i32
  }
  func.func @transform_8(%arg0: i32) -> (i32, i32) {
    %c0_i32 = arith.constant 0 : i32
    %c0_i32_0 = arith.constant 0 : i32
    %c0_i32_1 = arith.constant 0 : i32
    return %c0_i32, %c0_i32_0 : i32, i32
  }
  func.func @transform_9(%arg0: i32) -> (i32, i32) {
    %c0_i32 = arith.constant 0 : i32
    %c0_i32_0 = arith.constant 0 : i32
    %c0_i32_1 = arith.constant 0 : i32
    return %c0_i32, %c0_i32_0 : i32, i32
  }
  func.func @transform_10(%arg0: i32) -> (i32, i32) {
    %c0_i32 = arith.constant 0 : i32
    %c0_i32_0 = arith.constant 0 : i32
    %c0_i32_1 = arith.constant 0 : i32
    return %c0_i32, %c0_i32_0 : i32, i32
  }
  func.func @transform_11(%arg0: i32) -> (i32, i32) {
    %c0_i32 = arith.constant 0 : i32
    %c0_i32_0 = arith.constant 0 : i32
    %c0_i32_1 = arith.constant 0 : i32
    return %c0_i32, %c0_i32_0 : i32, i32
  }
  func.func @transform_12(%arg0: i32) -> (i32, i32) {
    %c0_i32 = arith.constant 0 : i32
    %c0_i32_0 = arith.constant 0 : i32
    %c0_i32_1 = arith.constant 0 : i32
    return %c0_i32, %c0_i32_0 : i32, i32
  }
  func.func @transform_13(%arg0: i32) -> (i32, i32) {
    %c0_i32 = arith.constant 0 : i32
    %c0_i32_0 = arith.constant 0 : i32
    %c0_i32_1 = arith.constant 0 : i32
    return %c0_i32, %c0_i32_0 : i32, i32
  }
  func.func @transform_14(%arg0: i32) -> (i32, i32) {
    %c0_i32 = arith.constant 0 : i32
    %c0_i32_0 = arith.constant 0 : i32
    %c0_i32_1 = arith.constant 0 : i32
    return %c0_i32, %c0_i32_0 : i32, i32
  }
  func.func @transform_15(%arg0: i32) -> (i32, i32) {
    %c0_i32 = arith.constant 0 : i32
    %c0_i32_0 = arith.constant 0 : i32
    %c0_i32_1 = arith.constant 0 : i32
    return %c0_i32, %c0_i32_0 : i32, i32
  }
  func.func @transform_16(%arg0: i32) -> (i32, i32) {
    %c0_i32 = arith.constant 0 : i32
    %c0_i32_0 = arith.constant 0 : i32
    %c0_i32_1 = arith.constant 0 : i32
    return %c0_i32, %c0_i32_0 : i32, i32
  }
  func.func @transform_17(%arg0: i32) -> (i32, i32) {
    %c0_i32 = arith.constant 0 : i32
    %c0_i32_0 = arith.constant 0 : i32
    %c0_i32_1 = arith.constant 0 : i32
    return %c0_i32, %c0_i32_0 : i32, i32
  }
  func.func @transform_18(%arg0: i32) -> (i32, i32, i32) {
    %c0_i32 = arith.constant 0 : i32
    %c0_i32_0 = arith.constant 0 : i32
    %c0_i32_1 = arith.constant 0 : i32
    return %arg0, %c0_i32, %c0_i32_0 : i32, i32, i32
  }
}

</mosaic_0001>

<bundles_post_ra>
// kernel: tpu_custom_call.1
= control target key start
LH: loop header
LB: loop body
LE: loop exit
PB: predicated region body
PF: predicated region fallthrough
CT: control target
= control target key end

     0   :  { %s2102_s0 = inlined_call_operand.vmem [shape: f32[2,8,16], index: 0, kind: input, shape index: {}]   ;;  %s2103_s1 = inlined_call_operand.vmem [shape: f32[2,8,1], index: 1, kind: input, shape index: {}]   ;;  %s2104_s2 = inlined_call_operand.vmem [shape: f32[2,8,32], index: 2, kind: input, shape index: {}]   ;;  %s2105_s3 = inlined_call_operand.vmem [shape: f32[2,1,8], index: 3, kind: input, shape index: {}]   ;;  %s2106_s4 = inlined_call_operand.vmem [shape: bf16[16,32], index: 4, kind: input, shape index: {}]   ;;  %s2107_s5 = inlined_call_operand.vmem [shape: f32[1,32], index: 5, kind: input, shape index: {}]   ;;  %s2108_s6 = inlined_call_operand.vmem [shape: bf16[32,96], index: 6, kind: input, shape index: {}]   ;;  %s2109_s7 = inlined_call_operand.vmem [shape: f32[1,96], index: 7, kind: input, shape index: {}]   ;;  %s2110_s8 = inlined_call_operand.hbm [shape: bf16[32,32], index: 8, kind: input, shape index: {}]   ;;  %s2111_s9 = inlined_call_operand.vmem [shape: f32[1,32], index: 9, kind: input, shape index: {}]   ;;  %s2112_s10 = inlined_call_operand.vmem [shape: f32[1,32], index: 10, kind: input, shape index: {}]   ;;  %s2113_s11 = inlined_call_operand.vmem [shape: f32[1,32], index: 11, kind: input, shape index: {}]   ;;  %s2114_s12 = inlined_call_operand.hbm [shape: bf16[32,64], index: 12, kind: input, shape index: {}]   ;;  %s2115_s13 = inlined_call_operand.hbm [shape: f32[1,64], index: 13, kind: input, shape index: {}]   ;;  %s2116_s14 = inlined_call_operand.vmem [shape: bf16[64,32], index: 14, kind: input, shape index: {}]   ;;  %s2117_s15 = inlined_call_operand.vmem [shape: f32[1,32], index: 15, kind: input, shape index: {}]   ;;  %s2118_s16 = inlined_call_operand.vmem [shape: f32[1,32], index: 16, kind: input, shape index: {}]   ;;  %s2119_s17 = inlined_call_operand.vmem [shape: f32[1,32], index: 17, kind: input, shape index: {}]   ;;  %s2120_s18 = inlined_call_operand.hbm [shape: f32[2,8,32], index: 18, kind: output, shape index: {}]  }
   0x1   :  { %2127 = sst [smem:[#allocation18_spill]] %s2102_s0 }
   0x2   :  { %2128 = sst [smem:[#allocation19_spill]] %s2103_s1 }
   0x3   :  { %2129 = sst [smem:[#allocation20_spill]] %s2104_s2 }
   0x4   :  { %2130 = sst [smem:[#allocation21_spill]] %s2110_s8 }
   0x5   :  { %2131 = sst [smem:[#allocation22_spill]] %s2114_s12 }
   0x6   :  { %2132 = sst [smem:[#allocation23_spill]] %s2119_s17 }
   0x7   :  { %23 = vsyncpa [#allocation3], 0 }
   0x8   :  { %24 = vsyncpa [#allocation6], 0 }
   0x9   :  { %25 = vsyncpa [#allocation4], 0 }
   0xa   :  { %27 = vsyncpa [#allocation4 + $0x1], 0  ;;  %s1857_s27 = smov 0   ;;  %s1859_s28 = smov 0  }
   0xb   :  { %s1861_s29 = smov 0   ;;  %s1863_s30 = smov 0  }
   0xc LB: > { %2133 = sst [smem:[#allocation12_spill]] %s1729_s27  ;;  %s1878_s0 = sadd.s32 4294967295, %s1741_s30   ;;  %s1741_s30 = sphi %s1863_s30, %s2152_s30   ;;  %s1737_s29 = sphi %s1861_s29, %s2154_s29   ;;  %s1733_s28 = sphi %s1859_s28, %s2156_s28   ;;  %s1729_s27 = sphi %s1857_s27, %s2155_s27  }
   0xd   : > { %2134 = sst [smem:[#allocation13_spill]] %s1737_s29  ;;  %s1384_s19 = sadd.s32 4294967294, %s1741_s30  }
   0xe   : > { %2135 = sst [smem:[#allocation14_spill]] %s1741_s30  ;;  %s1882_s1 = sadd.s32 1, %s1741_s30  }
   0xf   : > { %2136 = sst [smem:[#allocation15_spill]] %s1882_s1  ;;  %s438_s20 = sadd.s32 1, %s1737_s29 }
  0x10   : > { %s435_s21 = ssub.s32 %s1741_s30, %s1882_s1  ;;  %p448_p0 = scmp.ne.s32.totalorder %s1737_s29, %s1733_s28 }
  0x11   : > { %p436_p1 = scmp.eq.s32.totalorder %s435_s21, 0  ;;  %p449_p2 = scmp.eq.s32.totalorder %s1878_s0, 1 }
  0x12   : > { %p454_p3 = scmp.ne.s32.totalorder %s1733_s28, %s1729_s27  ;;  %p455_p4 = scmp.eq.s32.totalorder %s1384_s19, 1 }
  0x13   : > { %s1893_s22 = scalar_select %p436_p1, %s1737_s29, %s438_s20  }
  0x14   : > { %p1895_p5 = por %p449_p2, %p448_p0  ;;  %p1899_p6 = por %p455_p4, %p454_p3 }
  0x15   : > { %2137 = sst [smem:[#allocation16_spill]] %s1893_s22  ;;  %p1385_p7 = scmp.ge.s32.totalorder %s1741_s30, 1 }
  0x16   : > { %s2139_s23 = scalar_select %p1899_p6, 1, 0 }
  0x17   : > { %p462_p8 = scmp.lt.s32.totalorder %s1741_s30, 3  ;;  %p1491_p9 = scmp.eq.s32.totalorder %s1878_s0, 0 }
  0x18   : > { %2140 = sst [smem:[#allocation17_spill]] %s2139_s23  ;;  %s1743_s1 = smov [#allocation5]  }
  0x19   : > { %p1906_p10 = pnand %p1385_p7, %p462_p8  ;;  %s2142_s12 = sld [smem:[#allocation22_spill]] }
  0x1a   : > { %s2143_s8 = sld [smem:[#allocation21_spill]]  ;;  %s510_s23 = sshll.u32 %s1743_s1, 4  ;;  %s511_s23 = int_to_ptr.vmem [resolvable:$true] %s510_s23 }
  0x1b   : > { %p1477_p11 = pneg %p1906_p10  ;;  %s1744_s25 = smov 64  }
  0x1c   : > { %s1745_s26 = smov 4   ;;  %s1747_s30 = smov [#allocation7]  }
  0x1d   : > { %p1920_p12 = pnand %p1491_p9, %p1477_p11  ;;  %s525_s17 = sshll.u32 %s1747_s30, 4  ;;  %s526_s17 = int_to_ptr.vmem [resolvable:$true] %s525_s17 }
  0x1f   : > { %s508_s19 = sshll.u32 %s2142_s12, 4  ;;  %s1746_s12 = smov [#allocation2]   ;;  %s509_s19 = int_to_ptr.hbm [resolvable:$true] %s508_s19 }
  0x20   : > { %s485_s22 = sshll.u32 %s2143_s8, 4  ;;  %s487_s27 = sshll.u32 %s1746_s12, 4  ;;  %s486_s22 = int_to_ptr.hbm [resolvable:$true] %s485_s22  ;;  %s488_s27 = int_to_ptr.vmem [resolvable:$true] %s487_s27 }
  0x21   : > { %1483 = dma.hbm_to_vmem [thread:$0]  (!%p1920_p12), %s509_s19, 256, %s511_s23, [#allocation6], %s1744_s25, %s1744_s25, %s1745_s26  }
  0x22   : > { %s523_s8 = sshll.u32 %s2115_s13, 4  ;;  %577 = sbr.rel (%p1906_p10) target bundleno = 2849 (0xb21), region = 92  ;;  %s524_s8 = int_to_ptr.hbm [resolvable:$true] %s523_s8 }
  0x23   : > { %1480 = dma.hbm_to_vmem [thread:$0]  (!%p1920_p12), %s486_s22, 256, %s488_s27, [#allocation3], %s1744_s25, %s1744_s25, %s1745_s26  }
  0x24   : > { %1486 = dma.hbm_to_vmem [thread:$0]  (!%p1920_p12), %s524_s8, 16, %s526_s17, [#allocation6]  }
  0x27   : > { %1716 = dma.done.wait (%p1491_p9), [#allocation3], 256  }
  0x28   : > { %1718 = vsyncadd (%p1491_p9), [#allocation3], 4294967040 }
  0x29   : > { %1720 = dma.done.wait (%p1491_p9), [#allocation6], 272  }
  0x2a   : > { %1722 = vsyncadd (%p1491_p9), [#allocation6], 4294967024  ;;  %p652_p13 = scmp.lt.s32.totalorder %s1878_s0, 1  ;;  %v1748_v0 = vmov 0   ;;  %s2145_s29 = sld [smem:[#allocation18_spill]]  ;;  %v1454_v1 = vld [vmem:[%s2106_s4] sm:$0xff] }
  0x2b   : > { %1549 = vset.pattern.permute.xlu0 %v1748_v0  ;;  %s2146_s23 = sld [smem:[#allocation19_spill]]  ;;  %vm682_vm0 = vcmask 130048   ;;  %v1456_v5 = vld [vmem:[%s2108_s6 + $0x8] sm:$0xff]  ;;  %693 = vmatpush.bf16.msra.mxu0 %v1454_v1  ;;  %v1455_v6 = vld [vmem:[%s2108_s6] sm:$0xff]  ;;  %vm732_vm1 = vcmask 261120   ;;  %s1749_s19 = smov 64  }
  0x2c   : > { %s1945_s8 = scalar_select %p652_p13, %s1878_s0, 1  ;;  %742 = vmatpush.bf16.msra.mxu1 %v1456_v5  ;;  %v1550_v9 = vld [vmem:[%s2107_s5] ss:$0 sm:$0xff]  ;;  %vm800_vm2 = vcmask 1043456   ;;  %vm758_vm3 = vcmask 64512   ;;  %vm1194_vm9 = vcmask 523264  }
  0x2d   : > { %s2147_s1 = sld [smem:[#allocation20_spill]]  ;;  %v1551_v16 = vld [vmem:[%s2109_s7] ss:$0 sm:$0xff]  ;;  %s1750_s25 = smov 96   ;;  %v1757_v35 = vmov -1e+09  }
  0x2e   : > { %s1395_s12 = sshll.u32 %s1945_s8, 3  ;;  %s1751_s26 = smov 88   ;;  %v818_v25 = vld [vmem:[#allocation2] sm:$0xf]  ;;  %v898_v63 = vld [vmem:[#allocation2 + $0x4] sm:$0xf] }
  0x2f   : > { %s1752_s20 = smov 120   ;;  %s1753_s21 = smov 56   ;;  %v823_v26 = vsel %vm800_vm2, %v818_v25, 0  ;;  %v903_v0 = vsel %vm800_vm2, %v898_v63, 0 }
  0x30   : > { %s655_s30 = scalar_lea.vmem %s2145_s29, %s1395_s12  ;;  %743 = vmatpush.bf16.msra.mxu1 %v1455_v6  ;;  %s1754_s17 = smov 80   ;;  %832 = vmatpush.bf16.msrb.mxu0 %v823_v26 }
  0x31   : > { %s659_s24 = scalar_lea.vmem %s2146_s23, %s1395_s12  ;;  %v668_v2 = vld [vmem:[%s655_s30] sm:$0xff]  ;;  %s1755_s27 = smov 104  }
  0x32   : > { %v699_v3 = vld [vmem:[%s659_s24] sm:$0xff]  ;;  %v669_v4 = vpack.c.bf16 %v668_v2, %v668_v2  ;;  %s1756_s29 = smov 112   ;;  %s666_s22 = scalar_lea.vmem %s2105_s3, %s1945_s8 }
  0x33   : > { %703 = vperm.xlu0 %1549, %v699_v3   ;;  %s663_s30 = scalar_lea.vmem %s2147_s1, %s1395_s12  ;;  %v708_v34 = vld [vmem:[%s666_s22] sm:$0x1]  ;;  %s1758_s8 = smov 72  }
  0x34   : > { %1402 = vmatmul.msk.bf16.vlgmr.msra.gmra.mxu0 %vm682_vm0, %v669_v4  ;;  %v700_v7 = vld [vmem:[%s663_s30] sm:$0xff]  ;;  %vm709_vm4 = vcmp.gt.f32.partialorder %v708_v34, 0.0  ;;  %s1759_s23 = smov 40   ;;  %s2148_s22 = sld [smem:[#allocation23_spill]] }
  0x35   : > { %v710_v36 = vsel %vm709_vm4, 0.0, %v1757_v35 }
  0x36   : > { %v1999_v37 = vperm.slane %v710_v36, 0 }
  0xa5   : > { %v704_v8 = vpop.permute.xlu0 %703 }
  0xa6   : > { %v706_v10 = vmul.f32 %v704_v8, %v700_v7 }
  0xb1   : > { %v695_v11 = vpop.f32.mrf.mxu0 }
  0xb2   : > { %v696_v12 = vadd.f32 %v1550_v9, %v695_v11 }
  0xb4   : > { %v1969_v13 = vadd.f32 %v706_v10, %v696_v12 }
  0xb6   : > { %v711_v14 = vpack.c.bf16 %v1969_v13, %v1969_v13 }
  0xb8   : > { %1411 = vmatmul.msk.bf16.vlgmr.msra.gmra.mxu1 %vm732_vm1, %v711_v14 }
  0xb9   : > { %v697_v15 = vpop.f32.mrf.mxu0 }
 0x135   : > { %v745_v17 = vpop.f32.mrf.mxu1 }
 0x136   : > { %v746_v18 = vadd.f32 %v1551_v16, %v745_v17 }
 0x138   : > { %v1977_v19 = vpack.c.bf16 %v746_v18, %v746_v18 }
 0x13a   : > { %795 = vrot.lane.b32.xlu2 %v1977_v19, %s1749_s19  ;;  %756 = vrot.lane.b32.xlu0 %v1977_v19, %s1750_s25  ;;  %s1760_s19 = smov 48  }
 0x13d   : > { %v747_v20 = vpop.f32.mrf.mxu1 }
 0x142   : > { %841 = vrot.lane.b32.xlu2 %v1977_v19, %s1751_s26  ;;  %839 = vrot.lane.b32.xlu0 %v1977_v19, %s1752_s20  ;;  %s1451_s26 = sshll.u32 %s1878_s0, 3 }
 0x14a   : > { %876 = vrot.lane.b32.xlu0 %v1977_v19, %s1753_s21 }
 0x152   : > { %921 = vrot.lane.b32.xlu0 %v1977_v19, %s1754_s17 }
 0x15a   : > { %999 = vrot.lane.b32.xlu0 %v1977_v19, %s1755_s27 }
 0x162   : > { %919 = vrot.lane.b32.xlu0 %v1977_v19, %s1756_s29  ;;  %s1256_s29 = scalar_lea.hbm %s2120_s18, %s1451_s26 }
 0x194   : > { %v796_v21 = vpop.permute.xlu2 %795 }
 0x195   : > { %v802_v22 = vsel %vm800_vm2, %v796_v21, 0 }
 0x196   : > { %811 = vmatpush.bf16.msra.mxu3 %v802_v22 }
 0x19c   : > { %v842_v23 = vpop.permute.xlu2 %841 }
 0x19d   : > { %v847_v24 = vsel %vm758_vm3, %v842_v23, 0 }
 0x19e   : > { %856 = vmatpush.bf16.xpose.msrb.mxu3 %v847_v24 }
 0x1ac   : > { %v757_v27 = vpop.permute.xlu0 %756 }
 0x1ad   : > { %v763_v28 = vsel %vm758_vm3, %v757_v27, 0 }
 0x1ae   : > { %772 = vmatpush.bf16.xpose.msra.mxu2 %v763_v28 }
 0x1b4   : > { %v840_v29 = vpop.permute.xlu0 %839 }
 0x1b5   : > { %1412 = vmatmul.msk.bf16.vlgmr.msra.gmra.mxu2 %vm758_vm3, %v1977_v19 }
 0x1b6   : > { %912 = vmatpush.bf16.msrb.mxu2 %v903_v0 }
 0x1bc   : > { %v877_v30 = vpop.permute.xlu0 %876 }
 0x1bd   : > { %v882_v31 = vsel %vm800_vm2, %v877_v30, 0  ;;  %v1552_v30 = vld [vmem:[%s2111_s9] ss:$0 sm:$0xff] }
 0x1be   : > { %891 = vmatpush.bf16.msrb.mxu1 %v882_v31 }
 0x1c4   : > { %v922_v32 = vpop.permute.xlu0 %921 }
 0x1c5   : > { %v927_v33 = vsel %vm758_vm3, %v922_v32, 0 }
 0x1c6   : > { %936 = vmatpush.bf16.xpose.msra.mxu0 %v927_v33 }
 0x1cc   : > { %v1000_v54 = vpop.permute.xlu0 %999 }
 0x1d4   : > { %v920_v58 = vpop.permute.xlu0 %919 }
 0x238   : > { %v774_v38 = vpop.f32.mrf.mxu2 }
 0x239   : > { %v778_v39 = vmul.f32 0.35355338, %v774_v38 }
 0x23b   : > { %v782_v40 = vadd.f32 %v1999_v37, %v778_v39 }
 0x23d   : > { %v783_v41 = vsel %vm758_vm3, %v782_v40, -inf }
 0x23e   : > { %784 = vmax.xlane.f32.xlu1 %v783_v41 }
 0x240   : > { %v776_v42 = vpop.f32.mrf.mxu2 }
 0x2b1   : > { %v785_v43 = vpop.xlane.xlu1 %784 }
 0x2b2   : > { %v786_v44 = vsub.f32 %v782_v40, %v785_v43 }
 0x2b4   : > { %v787_v45 = vmul.f32 1.442695, %v786_v44 }
 0x2b6   : > { %1559 = vpow2.f32 %v787_v45 }
 0x2bc   : > { %v1560_v46 = vpop.eup %1559 }
 0x2bd   : > { %v789_v47 = vsel %vm758_vm3, %v1560_v46, 0.0 }
 0x2be   : > { %790 = vadd.xlane.f32.xlu1 %v789_v47 }
 0x331   : > { %v791_v48 = vpop.xlane.xlu1 %790 }
 0x332   : > { %1561 = vrcp.f32 %v791_v48 }
 0x338   : > { %v1562_v49 = vpop.eup %1561 }
 0x339   : > { %v793_v50 = vmul.f32 %v1562_v49, %v1560_v46 }
 0x33b   : > { %v794_v51 = vpack.c.bf16 %v793_v50, %v793_v50 }
 0x33d   : > { %1413 = vmatmul.msk.bf16.vlgmr.msra.gmra.mxu3 %vm758_vm3, %v794_v51 }
 0x34d   : > { %1415 = vmatmul.msk.bf16.vlgmr.msrb.gmra.mxu3 %vm758_vm3, %v840_v29 }
 0x3c0   : > { %v813_v52 = vpop.f32.mrf.mxu3 }
 0x3c1   : > { %v817_v53 = vpack.c.bf16 %v813_v52, %v813_v52 }
 0x3c3   : > { %1414 = vmatmul.msk.bf16.vlgmr.msrb.gmra.mxu0 %vm758_vm3, %v817_v53 }
 0x3c8   : > { %v815_v55 = vpop.f32.mrf.mxu3 }
 0x3c9   : > { %v1058_v55 = vld [vmem:[#allocation2 + $0xc] sm:$0xf] }
 0x3d0   : > { %v858_v56 = vpop.f32.mrf.mxu3 }
 0x3d1   : > { %v862_v57 = vmul.f32 0.35355338, %v858_v56  ;;  %v978_v56 = vld [vmem:[#allocation2 + $0x8] sm:$0xf] }
 0x3d3   : > { %1418 = vmatmul.msk.bf16.vlgmr.msra.gmra.mxu0 %vm758_vm3, %v920_v58  ;;  %v863_v59 = vadd.f32 %v862_v57, %v1999_v37  ;;  %v983_v57 = vsel %vm800_vm2, %v978_v56, 0 }
 0x3d4   : > { %992 = vmatpush.bf16.msra.mxu1 %v983_v57 }
 0x3d5   : > { %v864_v60 = vsel %vm758_vm3, %v863_v59, -inf }
 0x3d6   : > { %865 = vmax.xlane.f32.xlu1 %v864_v60 }
 0x3d8   : > { %v860_v61 = vpop.f32.mrf.mxu3 }
 0x3ef   : > { %1001 = vrot.lane.b32.xlu1 %v1977_v19, %s1758_s8 }
 0x440   : > { %v834_v62 = vpop.f32.mrf.mxu0 }
 0x441   : > { %v838_v31 = vadd.f32 %v1552_v30, %v834_v62 }
 0x448   : > { %v836_v1 = vpop.f32.mrf.mxu0 }
 0x449   : > { %v866_v2 = vpop.xlane.xlu1 %865 }
 0x44a   : > { %v867_v3 = vsub.f32 %v863_v59, %v866_v2 }
 0x44c   : > { %v868_v4 = vmul.f32 1.442695, %v867_v3 }
 0x44e   : > { %1563 = vpow2.f32 %v868_v4 }
 0x450   : > { %v938_v5 = vpop.f32.mrf.mxu0 }
 0x451   : > { %v942_v6 = vmul.f32 0.35355338, %v938_v5 }
 0x453   : > { %v943_v7 = vadd.f32 %v942_v6, %v1999_v37 }
 0x454   : > { %v1564_v8 = vpop.eup %1563 }
 0x455   : > { %v870_v9 = vsel %vm758_vm3, %v1564_v8, 0.0  ;;  %v944_v10 = vsel %vm758_vm3, %v943_v7, -inf }
 0x456   : > { %871 = vadd.xlane.f32.xlu2 %v870_v9  ;;  %945 = vmax.xlane.f32.xlu1 %v944_v10 }
 0x458   : > { %v940_v11 = vpop.f32.mrf.mxu0 }
 0x461   : > { %v1002_v12 = vpop.permute.xlu1 %1001 }
 0x462   : > { %v1007_v14 = vsel %vm758_vm3, %v1002_v12, 0 }
 0x463   : > { %1016 = vmatpush.bf16.xpose.msra.mxu2 %v1007_v14 }
 0x46f   : > { %1036 = vrot.lane.b32.xlu1 %v1977_v19, %s1759_s23  ;;  %s1260_s23 = sshll.u32 %s1256_s29, 4  ;;  %s1261_s23 = int_to_ptr.hbm [resolvable:$true] %s1260_s23 }
 0x470   : > { %s1685_s12 = sshra.s32 %s1261_s23, 4  ;;  %s1686_s12 = int_to_ptr.hbm [resolvable:$true] %s1685_s12 }
 0x471   : > { %s1687_s26 = scalar_lea.hbm %s1686_s12, 8  ;;  %p1692_p3 = scmp.lt.s32.totalorder %s1686_s12, %s2120_s18 }
 0x472   : > { %p1688_p0 = scmp.ne.s32.totalorder %s1686_s12, %s1687_s26 }
 0x474   : > { %p1689_p1 = pnand %p1688_p0, %p1895_p5 }
 0x476   : > { %p1690_p2 = pneg %p1689_p1 }
 0x4c9   : > { %v872_v15 = vpop.xlane.xlu2 %871  ;;  %v946_v16 = vpop.xlane.xlu1 %945 }
 0x4ca   : > { %1565 = vrcp.f32 %v872_v15  ;;  %v947_v17 = vsub.f32 %v943_v7, %v946_v16 }
 0x4cc   : > { %v948_v18 = vmul.f32 1.442695, %v947_v17 }
 0x4ce   : > { %1567 = vpow2.f32 %v948_v18 }
 0x4d0   : > { %v1566_v20 = vpop.eup %1565 }
 0x4d1   : > { %v874_v21 = vmul.f32 %v1566_v20, %v1564_v8  ;;  %v1761_v8 = vmov 32.0  }
 0x4d3   : > { %v875_v22 = vpack.c.bf16 %v874_v21, %v874_v21  ;;  %v1458_v21 = vld [vmem:[#allocation5 + $0x8] sm:$0xff] }
 0x4d4   : > { %v1568_v23 = vpop.eup %1567 }
 0x4d5   : > { %1416 = vmatmul.msk.bf16.vlgmr.msrb.gmra.mxu1 %vm758_vm3, %v875_v22  ;;  %v950_v24 = vsel %vm758_vm3, %v1568_v23, 0.0  ;;  %v1457_v22 = vld [vmem:[#allocation5] sm:$0xff] }
 0x4d6   : > { %951 = vadd.xlane.f32.xlu2 %v950_v24  ;;  %1149 = vmatpush.bf16.msrb.mxu1 %v1458_v21 }
 0x4da   : > { %1150 = vmatpush.bf16.msrb.mxu1 %v1457_v22 }
 0x4e1   : > { %v1037_v25 = vpop.permute.xlu1 %1036 }
 0x4e2   : > { %v1042_v26 = vsel %vm800_vm2, %v1037_v25, 0 }
 0x4e3   : > { %1051 = vmatpush.bf16.msrb.mxu0 %v1042_v26  ;;  %v1461_v26 = vld [vmem:[%s2116_s14 + $0x10] sm:$0xff] }
 0x549   : > { %v952_v46 = vpop.xlane.xlu2 %951 }
 0x552   : > { %v893_v27 = vpop.f32.mrf.mxu1 }
 0x553   : > { %v897_v28 = vpack.c.bf16 %v893_v27, %v893_v27 }
 0x555   : > { %1417 = vmatmul.msk.bf16.vlgmr.msrb.gmra.mxu2 %vm758_vm3, %v897_v28 }
 0x55a   : > { %v895_v29 = vpop.f32.mrf.mxu1 }
 0x565   : > { %1421 = vmatmul.msk.bf16.vlgmr.msra.gmra.mxu2 %vm758_vm3, %v1000_v54 }
 0x5d8   : > { %v914_v32 = vpop.f32.mrf.mxu2 }
 0x5d9   : > { %v918_v33 = vadd.f32 %v914_v32, %v838_v31 }
 0x5e0   : > { %v916_v34 = vpop.f32.mrf.mxu2 }
 0x5e1   : > { %v1553_v34 = vld [vmem:[%s2112_s10] ss:$0 sm:$0xff] }
 0x5e8   : > { %v1018_v35 = vpop.f32.mrf.mxu2 }
 0x5e9   : > { %v1022_v36 = vmul.f32 0.35355338, %v1018_v35 }
 0x5eb   : > { %v1023_v38 = vadd.f32 %v1022_v36, %v1999_v37  ;;  %v1554_v36 = vld [vmem:[%s2113_s11] ss:$0 sm:$0xff] }
 0x5ed   : > { %v1024_v39 = vsel %vm758_vm3, %v1023_v38, -inf }
 0x5ee   : > { %1025 = vmax.xlane.f32.xlu0 %v1024_v39 }
 0x5f0   : > { %v1020_v40 = vpop.f32.mrf.mxu2 }
 0x661   : > { %v1026_v41 = vpop.xlane.xlu0 %1025 }
 0x662   : > { %v1027_v42 = vsub.f32 %v1023_v38, %v1026_v41 }
 0x664   : > { %v1028_v43 = vmul.f32 1.442695, %v1027_v42  ;;  %v1460_v42 = vld [vmem:[%s2116_s14 + $0x8] sm:$0xff] }
 0x666   : > { %1569 = vpow2.f32 %v1028_v43  ;;  %v1459_v43 = vld [vmem:[%s2116_s14] sm:$0xff] }
 0x667   : > { %1571 = vrcp.f32 %v952_v46 }
 0x66c   : > { %v1570_v44 = vpop.eup %1569 }
 0x66d   : > { %v1030_v45 = vsel %vm758_vm3, %v1570_v44, 0.0  ;;  %v1572_v37 = vpop.eup %1571 }
 0x66e   : > { %1031 = vadd.xlane.f32.xlu2 %v1030_v45  ;;  %v954_v49 = vmul.f32 %v1572_v37, %v1568_v23  ;;  %v1462_v23 = vld [vmem:[%s2116_s14 + $0x18] sm:$0xff] }
 0x66f   : > { %1202 = vmatpush.bf16.msrb.mxu2 %v1462_v23 }
 0x670   : > { %v955_v54 = vpack.c.bf16 %v954_v49, %v954_v49  ;;  %v1556_v49 = vld [vmem:[%s2117_s15] ss:$0 sm:$0xff] }
 0x673   : > { %1203 = vmatpush.bf16.msrb.mxu2 %v1461_v26 }
 0x677   : > { %1204 = vmatpush.bf16.msrb.mxu2 %v1460_v42 }
 0x67b   : > { %1205 = vmatpush.bf16.msrb.mxu2 %v1459_v43 }
 0x686   : > { %956 = vrot.lane.b32.xlu2 %v1977_v19, %s1760_s19  ;;  %v1063_v19 = vsel %vm800_vm2, %v1058_v55, 0  ;;  %s649_s19 = sand.u32 1, %s1733_s28  }
 0x687   : > { %s1394_s25 = sshll.u32 %s649_s19, 3  ;;  %s1246_s24 = scalar_lea.sflag [#allocation4], %s649_s19 }
 0x688   : > { %s651_s8 = scalar_lea.vmem [#allocation8], %s1394_s25  ;;  %s1691_s25 = scalar_lea.hbm %s2120_s18, 16 }
 0x689   : > { %s1258_s0 = sshll.u32 %s651_s8, 4  ;;  %p1693_p4 = scmp.lt.s32.totalorder %s1691_s25, %s1687_s26  ;;  %s1259_s0 = int_to_ptr.vmem [resolvable:$true] %s1258_s0 }
 0x68b   : > { %p1694_p7 = por %p1693_p4, %p1692_p3 }
 0x68d   : > { %p1695_p8 = pnand %p1694_p7, %p1690_p2 }
 0x6e1   : > { %v1032_v47 = vpop.xlane.xlu2 %1031 }
 0x6e2   : > { %1573 = vrcp.f32 %v1032_v47 }
 0x6e3   : > { %1575 = vrcp.f32 %v1761_v8 }
 0x6e8   : > { %v1574_v48 = vpop.eup %1573 }
 0x6e9   : > { %v1034_v50 = vmul.f32 %v1574_v48, %v1570_v44  ;;  %v957_v51 = vpop.permute.xlu2 %956  ;;  %v1576_v9 = vpop.eup %1575  ;;  %v1555_v44 = vld [vmem:[#allocation7] ss:$0 sm:$0xff] }
 0x6ea   : > { %v962_v52 = vsel %vm800_vm2, %v957_v51, 0  ;;  %v1084_v10 = vmul.f32 32.0, %v1576_v9  ;;  %vm1088_vm5 = vweird.f32 %v1576_v9 }
 0x6eb   : > { %v1035_v53 = vpack.c.bf16 %v1034_v50, %v1034_v50  ;;  %971 = vmatpush.bf16.msra.mxu3 %v962_v52 }
 0x6ec   : > { %v1085_v11 = vsub.f32 1.0, %v1084_v10 }
 0x6ed   : > { %1422 = vmatmul.msk.bf16.vlgmr.msrb.gmra.mxu0 %vm758_vm3, %v1035_v53 }
 0x6ee   : > { %1419 = vmatmul.msk.bf16.vlgmr.msra.gmra.mxu3 %vm758_vm3, %v955_v54  ;;  %v1086_v12 = vmul.f32 %v1576_v9, %v1085_v11 }
 0x6ef   : > { %1072 = vmatpush.bf16.msrb.mxu3 %v1063_v19 }
 0x6f0   : > { %v1087_v14 = vadd.f32 %v1576_v9, %v1086_v12 }
 0x6f2   : > { %v1089_v15 = vsel %vm1088_vm5, %v1576_v9, %v1087_v14 }
 0x76a   : > { %v1053_v58 = vpop.f32.mrf.mxu0 }
 0x76b   : > { %v1057_v59 = vpack.c.bf16 %v1053_v58, %v1053_v58 }
 0x76d   : > { %1423 = vmatmul.msk.bf16.vlgmr.msrb.gmra.mxu3 %vm758_vm3, %v1057_v59 }
 0x771   : > { %v973_v60 = vpop.f32.mrf.mxu3 }
 0x772   : > { %v977_v61 = vpack.c.bf16 %v973_v60, %v973_v60  ;;  %v1055_v62 = vpop.f32.mrf.mxu0 }
 0x774   : > { %1420 = vmatmul.msk.bf16.vlgmr.msra.gmra.mxu1 %vm758_vm3, %v977_v61 }
 0x779   : > { %v975_v63 = vpop.f32.mrf.mxu3 }
 0x7f0   : > { %v1074_v0 = vpop.f32.mrf.mxu3 }
 0x7f1   : > { %v994_v1 = vpop.f32.mrf.mxu1 }
 0x7f2   : > { %v998_v2 = vadd.f32 %v994_v1, %v918_v33 }
 0x7f4   : > { %v1078_v3 = vadd.f32 %v1074_v0, %v998_v2 }
 0x7f6   : > { %v1079_v4 = vadd.f32 %v1078_v3, %v1969_v13 }
 0x7f8   : > { %v1076_v5 = vpop.f32.mrf.mxu3  ;;  %v1080_v6 = vsel %vm732_vm1, %v1079_v4, 0.0 }
 0x7f9   : > { %v996_v7 = vpop.f32.mrf.mxu1  ;;  %1081 = vadd.xlane.f32.xlu2 %v1080_v6 }
 0x7fa   : > { %v1558_v7 = vld [vmem:[%s2148_s22] ss:$0 sm:$0xff] }
 0x86c   : > { %v1082_v16 = vpop.xlane.xlu2 %1081 }
 0x86d   : > { %v1090_v17 = vmul.f32 %v1089_v15, %v1082_v16 }
 0x86f   : > { %v1091_v18 = vsub.f32 %v1079_v4, %v1090_v17  ;;  %v1557_v4 = vld [vmem:[%s2118_s16] ss:$0 sm:$0xff] }
 0x871   : > { %v1092_v20 = vmul.f32 %v1091_v18, %v1091_v18 }
 0x873   : > { %v1093_v13 = vsel %vm732_vm1, %v1092_v20, 0.0 }
 0x874   : > { %1094 = vadd.xlane.f32.xlu0 %v1093_v13 }
 0x8e7   : > { %v1095_v24 = vpop.xlane.xlu0 %1094 }
 0x8e8   : > { %v1096_v25 = vmul.f32 %v1095_v24, %v1089_v15 }
 0x8ea   : > { %v1097_v27 = vadd.f32 1e-05, %v1096_v25 }
 0x8ec   : > { %1577 = vrsqrt.f32 %v1097_v27  ;;  %vm1104_vm7 = vweird.f32 %v1097_v27 }
 0x8f2   : > { %v1578_v28 = vpop.eup %1577 }
 0x8f3   : > { %v1099_v29 = vmul.f32 %v1578_v28, %v1097_v27  ;;  %vm1105_vm6 = vweird.f32 %v1578_v28 }
 0x8f4   : > { %vm1106_vm8 = vmor %vm1104_vm7, %vm1105_vm6 }
 0x8f5   : > { %v1100_v30 = vmul.f32 %v1578_v28, %v1099_v29 }
 0x8f7   : > { %v1101_v31 = vmul.f32 0.5, %v1100_v30 }
 0x8f9   : > { %v1102_v32 = vsub.f32 1.5, %v1101_v31 }
 0x8fb   : > { %v1103_v33 = vmul.f32 %v1578_v28, %v1102_v32 }
 0x8fd   : > { %v1107_v35 = vsel %vm1106_vm8, %v1578_v28, %v1103_v33 }
 0x8fe   : > { %v1108_v38 = vmul.f32 %v1107_v35, %v1091_v18 }
 0x900   : > { %v1113_v39 = vmul.f32 %v1553_v34, %v1108_v38 }
 0x902   : > { %v1118_v40 = vadd.f32 %v1554_v36, %v1113_v39 }
 0x904   : > { %v1119_v41 = vpack.c.bf16 %v1118_v40, %v1118_v40 }
 0x906   : > { %1432 = vmatmul.msk.bf16.vlgmr.msrb.gmra.mxu1 %vm732_vm1, %v1119_v41 }
 0x983   : > { %v1152_v45 = vpop.f32.mrf.mxu1 }
 0x984   : > { %v1153_v46 = vadd.f32 %v1555_v44, %v1152_v45 }
 0x986   : > { %v1156_v47 = vmax.f32 %v1153_v46, 0.0 }
 0x988   : > { %v1157_v37 = vpack.c.bf16 %v1156_v47, %v1156_v47 }
 0x98a   : > { %1449 = vmatmul.msk.bf16.vlgmr.msrb.gmra.mxu2 %vm1194_vm9, %v1157_v37 }
 0x98b   : > { %v1154_v48 = vpop.f32.mrf.mxu1 }
 0xa0d   : > { %v1207_v50 = vpop.f32.mrf.mxu2 }
 0xa0e   : > { %v1208_v51 = vadd.f32 %v1556_v49, %v1207_v50 }
 0xa10   : > { %v1211_v52 = vadd.f32 %v1208_v51, %v1118_v40 }
 0xa12   : > { %v1212_v53 = vsel %vm732_vm1, %v1211_v52, 0.0 }
 0xa13   : > { %1213 = vadd.xlane.f32.xlu0 %v1212_v53 }
 0xa15   : > { %v1209_v54 = vpop.f32.mrf.mxu2 }
 0xa86   : > { %v1214_v55 = vpop.xlane.xlu0 %1213 }
 0xa87   : > { %v1215_v19 = vmul.f32 %v1214_v55, %v1089_v15 }
 0xa89   : > { %v1216_v56 = vsub.f32 %v1211_v52, %v1215_v19 }
 0xa8b   : > { %v1217_v57 = vmul.f32 %v1216_v56, %v1216_v56 }
 0xa8d   : > { %v1218_v58 = vsel %vm732_vm1, %v1217_v57, 0.0 }
 0xa8e   : > { %1219 = vadd.xlane.f32.xlu0 %v1218_v58 }
 0xb01   : > { %v1220_v59 = vpop.xlane.xlu0 %1219 }
 0xb02   : > { %v1221_v60 = vmul.f32 %v1220_v59, %v1089_v15 }
 0xb04   : > { %v1222_v61 = vadd.f32 1e-05, %v1221_v60 }
 0xb06   : > { %1579 = vrsqrt.f32 %v1222_v61  ;;  %vm1229_vm11 = vweird.f32 %v1222_v61 }
 0xb0c   : > { %v1580_v62 = vpop.eup %1579 }
 0xb0d   : > { %v1224_v63 = vmul.f32 %v1580_v62, %v1222_v61  ;;  %vm1230_vm10 = vweird.f32 %v1580_v62 }
 0xb0e   : > { %vm1231_vm12 = vmor %vm1229_vm11, %vm1230_vm10 }
 0xb0f   : > { %v1225_v0 = vmul.f32 %v1580_v62, %v1224_v63 }
 0xb11   : > { %v1226_v1 = vmul.f32 0.5, %v1225_v0 }
 0xb13   : > { %v1227_v2 = vsub.f32 1.5, %v1226_v1 }
 0xb15   : > { %v1228_v3 = vmul.f32 %v1580_v62, %v1227_v2 }
 0xb17   : > { %v1232_v5 = vsel %vm1231_vm12, %v1580_v62, %v1228_v3 }
 0xb18   : > { %v1233_v6 = vmul.f32 %v1232_v5, %v1216_v56 }
 0xb1a   : > { %v1238_v8 = vmul.f32 %v1557_v4, %v1233_v6 }
 0xb1c   : > { %v1243_v9 = vadd.f32 %v1558_v7, %v1238_v8 }
 0xb1e   : > { %1244 = vst.msk [vmem:[%s651_s8] sm:$0xff] %vm732_vm1, %v1243_v9 }
 0xb1f   : > { %1698 = shalt.err (!%p1695_p8)
}
 0xb20   : > { %1475 = dma.vmem_to_hbm [thread:$0]  (%p1895_p5), %s1259_s0, 128, %s1261_s23, %s1246_s24  }
 0xb21 PF: > { %s2149_s19 = sld [smem:[#allocation14_spill]] }
 0xb22   : > { %s2150_s29 = sld [smem:[#allocation12_spill]] }
 0xb27   : > { %p1497_p9 = scmp.ge.s32.totalorder %s2149_s19, 2 }
 0xb28   : > { %s1272_s30 = sand.u32 1, %s2150_s29  }
 0xb29   : > { %p1488_p10 = pnand %p1497_p9, %p1899_p6  ;;  %s1273_s22 = scalar_lea.sflag [#allocation4], %s1272_s30 }
 0xb2b   : > { %p1489_p11 = pneg %p1488_p10 }
 0xb2d   : > { %1724 = dma.done.wait (%p1489_p11), %s1273_s22, 128  }
 0xb2e   : > { %1726 = vsyncadd (%p1489_p11), %s1273_s22, 4294967168  ;;  %s2152_s30 = sld [smem:[#allocation15_spill]]  ;;  %s2155_s27 = smov %s1733_s28 }
 0xb2f   : > { %s2153_s8 = sld [smem:[#allocation13_spill]] }
 0xb30   : > { %s2154_s29 = sld [smem:[#allocation16_spill]] }
 0xb34   : > { %p30_p12 = scmp.ge.s32.totalorder %s2152_s30, 4  }
 0xb35   : > { %s2156_s28 = smov %s2153_s8 }
 0xb36   :  { %32 = sbr.rel (!%p30_p12) target bundleno = 12 (0xc), region = 149 }
 0xb3b   :  { %1279 = vsyncpa [#allocation3], 1 }
 0xb3c   :  { %1281 = vsyncpa [#allocation3 + $0x1], 1 }
 0xb3d   :  { %1282 = vsyncpa [#allocation6], 1 }
 0xb3e   :  { %1283 = vsyncpa [#allocation4], 1 }
 0xb3f   :  { %1285 = vsyncpa [#allocation4 + $0x1], 1 }

</bundles_post_ra>
